<compile_context>
chip_gen: v7x
topology: tpu7x:2x2x1
jax: 0.10.0
libtpu: 0.0.40
codegen_flags: <defaults>
</compile_context>

<pallas_src>
import math

import jax
import jax.numpy as jnp
from jax.experimental import pallas as pl
from jax.experimental.pallas import tpu as pltpu


def _poly_kernel(coef_ref, x_ref, o_ref):
    # coef_ref: SMEM (4,) float32 -> [a, b, c, d]  (scalar-prefetched)
    a = coef_ref[0]
    b = coef_ref[1]
    c = coef_ref[2]
    d = coef_ref[3]
    x = x_ref[...].astype(jnp.float32)
    # Horner: a + x*(b + x*(c + x*d)) -- fewer VALU ops than naive powers
    y = a + x * (b + x * (c + x * d))
    o_ref[...] = y.astype(o_ref.dtype)


def _cdiv(a, b):
    return -(-a // b)


def _round_up(a, b):
    return _cdiv(a, b) * b


def polynomial_forward(x, a, b, c, d):
    """Compute a + b*x + c*x^2 + d*x^3 elementwise with a Pallas TPU kernel."""
    orig_shape = x.shape
    out_dtype = x.dtype
    total = math.prod(orig_shape)
    itemsize = jnp.dtype(out_dtype).itemsize

    # Sublane packing per dtype: 8 (f32), 16 (bf16/f16), 32 (int8/fp8).
    sublane = max(8, 32 // itemsize)

    # Pick the widest lane count that divides the element count (no padding).
    lanes = None
    for cand in (1024, 512, 256, 128):
        if total % cand == 0:
            lanes = cand
            break
    pad = 0
    if lanes is None:
        # Fallback: minimal padding to a multiple of 128 lanes.
        lanes = 128
        pad = (-total) % lanes

    flat = x.reshape(-1)
    if pad:
        flat = jnp.pad(flat, (0, pad))
    rows = (total + pad) // lanes
    x2d = flat.reshape(rows, lanes)

    total_bytes = total * itemsize
    small_threshold = 1 * 1024 * 1024  # single-block fast path only for tiny inputs

    if total_bytes <= small_threshold or rows <= sublane:
        # One block covering the whole array: block_shape equals the array
        # dims, so the (8,128) divisibility constraint doesn't apply and there
        # is no per-step pipeline overhead.
        block_rows = rows
        grid_len = 1
    else:
        # Target ~8 MiB blocks (double-buffered in+out = 32 MiB VMEM), rows a
        # multiple of the sublane packing so stores stay unmasked.
        target_block_bytes = 8 * 1024 * 1024
        max_block_rows = max(
            sublane, (target_block_bytes // (lanes * itemsize)) // sublane * sublane
        )
        # Force >= 2 blocks so both v7x TensorCores get work.
        half_rows = _round_up(_cdiv(rows, 2), sublane)
        block_rows = min(max_block_rows, half_rows, _round_up(rows, sublane))
        grid_len = _cdiv(rows, block_rows)
        # Prefer an even grid so the last step doesn't idle one v7x core.
        if grid_len > 2 and grid_len % 2 == 1:
            grid_len += 1
            block_rows = _round_up(_cdiv(rows, grid_len), sublane)
            grid_len = _cdiv(rows, block_rows)

    coef = jnp.stack([a, b, c, d]).astype(jnp.float32)  # (4,) -> SMEM via prefetch

    # TODO(synk): consider input_output_aliases when the caller can donate x.
    out2d = pl.pallas_call(
        _poly_kernel,
        out_shape=jax.ShapeDtypeStruct((rows, lanes), out_dtype),
        grid_spec=pltpu.PrefetchScalarGridSpec(
            num_scalar_prefetch=1,           # coef lands in SMEM before the grid
            grid=(grid_len,),
            in_specs=[
                pl.BlockSpec((block_rows, lanes), lambda i, coef: (i, 0)),
            ],
            out_specs=pl.BlockSpec((block_rows, lanes), lambda i, coef: (i, 0)),
        ),
        compiler_params=pltpu.CompilerParams(
            # Row axis is independent -> shard across v7x's 2 TCs; no-op on v5e/v6e.
            dimension_semantics=("parallel",),
            # 48 MiB scoped: fits v7x (64 MiB physical) with headroom, lifts the
            # 16/32 MiB defaults on v5e/v6e for 8 MiB double-buffered blocks.
            vmem_limit_bytes=48 * 1024 * 1024,
        ),
        cost_estimate=pl.CostEstimate(
            flops=6 * total,
            transcendentals=0,
            bytes_accessed=2 * rows * lanes * itemsize,
        ),
    )(coef, x2d)

    if pad:
        return out2d.reshape(-1)[:total].reshape(orig_shape)
    return out2d.reshape(orig_shape)


if __name__ == "__main__":
    key = jax.random.PRNGKey(0)
    kx, ka, kb, kc, kd = jax.random.split(key, 5)

    # Deterministic scalar "parameters" (mirrors torch.randn(()) params)
    a = jax.random.normal(ka, ())
    b = jax.random.normal(kb, ())
    c = jax.random.normal(kc, ())
    d = jax.random.normal(kd, ())

    # Small NCHW input: batch=2, channels=4, spatial=16x16
    x = jax.random.normal(kx, (2, 4, 16, 16), dtype=jnp.float32)

    out = polynomial_forward(x, a, b, c, d)
    out = jax.block_until_ready(out)

    # Reference check in plain JAX
    ref = a + b * x + c * x**2 + d * x**3
    assert out.shape == x.shape
    assert out.dtype == x.dtype
    assert jnp.allclose(out, ref, atol=1e-5, rtol=1e-5), "mismatch vs reference"

    print("KERNEL_OK")
</pallas_src>

<mosaic_0001>
module attributes {stable_mosaic.version = 11 : i64} {
  func.func @_poly_kernel(%arg0: i32, %arg1: memref<4xf32, #tpu.memory_space<smem>>, %arg2: memref<2x1024xf32, #tpu.memory_space<vmem>>, %arg3: memref<2x1024xf32, #tpu.memory_space<vmem>>) attributes {dimension_semantics = [#tpu.dimension_semantics<parallel>], iteration_bounds = array<i64: 1>, scalar_prefetch = 1 : i64, scratch_operands = 0 : i64, tpu.core_type = #tpu.core_type<tc>, window_params = [{transform_indices = @transform_0, window_bounds = array<i64: 2, 1024>}, {transform_indices = @transform_1, window_bounds = array<i64: 2, 1024>}]} {
    %c0 = arith.constant 0 : index
    %0 = memref.load %arg1[%c0] : memref<4xf32, #tpu.memory_space<smem>>
    %c1 = arith.constant 1 : index
    %1 = memref.load %arg1[%c1] : memref<4xf32, #tpu.memory_space<smem>>
    %c2 = arith.constant 2 : index
    %2 = memref.load %arg1[%c2] : memref<4xf32, #tpu.memory_space<smem>>
    %c3 = arith.constant 3 : index
    %3 = memref.load %arg1[%c3] : memref<4xf32, #tpu.memory_space<smem>>
    %c0_0 = arith.constant 0 : index
    %c0_1 = arith.constant 0 : index
    %4 = vector.load %arg2[%c0_0, %c0_1] : memref<2x1024xf32, #tpu.memory_space<vmem>>, vector<2x1024xf32>
    %5 = vector.broadcast %3 : f32 to vector<2x1024xf32>
    %6 = arith.mulf %4, %5 : vector<2x1024xf32>
    %7 = vector.broadcast %2 : f32 to vector<2x1024xf32>
    %8 = arith.addf %7, %6 : vector<2x1024xf32>
    %9 = arith.mulf %4, %8 : vector<2x1024xf32>
    %10 = vector.broadcast %1 : f32 to vector<2x1024xf32>
    %11 = arith.addf %10, %9 : vector<2x1024xf32>
    %12 = arith.mulf %4, %11 : vector<2x1024xf32>
    %13 = vector.broadcast %0 : f32 to vector<2x1024xf32>
    %14 = arith.addf %13, %12 : vector<2x1024xf32>
    %c0_2 = arith.constant 0 : index
    %c0_3 = arith.constant 0 : index
    %15 = vector.load %arg3[%c0_2, %c0_3] : memref<2x1024xf32, #tpu.memory_space<vmem>>, vector<2x1024xf32>
    tpu.vector_store %arg3[%c0_2, %c0_3], %14 {strides = array<i32>} : memref<2x1024xf32, #tpu.memory_space<vmem>>, vector<2x1024xf32>,
    return
  }
  func.func @transform_0(%arg0: i32, %arg1: memref<4xf32, #tpu.memory_space<smem>>) -> (i32, i32) {
    %c0_i32 = arith.constant 0 : i32
    %c0_i32_0 = arith.constant 0 : i32
    return %arg0, %c0_i32 : i32, i32
  }
  func.func @transform_1(%arg0: i32, %arg1: memref<4xf32, #tpu.memory_space<smem>>) -> (i32, i32) {
    %c0_i32 = arith.constant 0 : i32
    %c0_i32_0 = arith.constant 0 : i32
    return %arg0, %c0_i32 : i32, i32
  }
}

</mosaic_0001>

<bundles_post_ra>
// kernel: tpu_custom_call.1
= control target key start
LH: loop header
LB: loop body
LE: loop exit
PB: predicated region body
PF: predicated region fallthrough
CT: control target
= control target key end

     0   :  { %s185_s0 = inlined_call_operand.hbm [shape: f32[4], index: 0, kind: input, shape index: {}]   ;;  %s186_s1 = inlined_call_operand.hbm [shape: f32[2,1024], index: 1, kind: input, shape index: {}]   ;;  %s187_s2 = inlined_call_operand.hbm [shape: f32[2,1024], index: 2, kind: output, shape index: {}]  }
   0x1   :  { %s71_s11 = scalar_lea.hbm %s185_s0, 16 }
   0x2   :  { %p72_p0 = scmp.ne.s32.totalorder %s185_s0, %s71_s11  ;;  %p75_p1 = scmp.lt.u32.totalorder %s71_s11, %s185_s0 }
   0x4   :  { %p77_p2 = pnand %p75_p1, %p72_p0 }
   0x6   :  { %80 = shalt.err (!%p77_p2)  }
   0x7   :  { %s131_s16 = smov [#allocation3]  }
   0x8   :  { %8 = dma.hbm_to_smem %s185_s0, 16, %s131_s16, [#allocation2] }
   0x9   :  { %125 = dma.done.wait [#allocation2], 16 }
   0xa   :  { %126 = vsyncadd [#allocation2], 4294967280 }
   0xb   :  { %10 = sfence }
   0xc   :  { %11 = vsyncpa [#allocation5], 0 }
   0xd   :  { %12 = vsyncpa [#allocation6], 0  ;;  %s132_s19 = smov [#allocation4]   ;;  %s81_s23 = scalar_lea.hbm %s186_s1, 256 }
   0xe   :  { %s19_s20 = sshll.u32 %s132_s19, 4  ;;  %p82_p3 = scmp.ne.s32.totalorder %s186_s1, %s81_s23  ;;  %s20_s20 = int_to_ptr.vmem [resolvable:$true] %s19_s20 }
   0xf   :  { %p85_p4 = scmp.lt.u32.totalorder %s81_s23, %s186_s1 }
  0x11   :  { %p87_p5 = pnand %p85_p4, %p82_p3 }
  0x13   :  { %90 = shalt.err (!%p87_p5)
}
  0x14   :  { %s91_s0 = scalar_lea.vmem %s20_s20, 256  ;;  %p96_p7 = scmp.lt.s32.totalorder %s20_s20, %s20_s20 }
  0x15   :  { %p92_p6 = scmp.ne.s32.totalorder %s20_s20, %s91_s0  ;;  %p97_p8 = scmp.lt.s32.totalorder %s91_s0, %s91_s0 }
  0x17   :  { %p98_p9 = por %p97_p8, %p96_p7 }
  0x19   :  { %p99_p10 = pnand %p98_p9, %p92_p6 }
  0x1b   :  { %102 = shalt.err (!%p99_p10)
}
  0x1c   :  { %22 = dma.hbm_to_vmem [thread:$0]  %s186_s1, 256, %s20_s20, [#allocation5]  }
  0x1d   :  { %127 = dma.done.wait [#allocation5], 256  }
  0x1e   :  { %128 = vsyncadd [#allocation5], 4294967040  ;;  %s66_s30 = sld [smem:[#allocation3 + $0x2]]  ;;  %s67_s3 = sld [smem:[#allocation3 + $0x3]]  ;;  %v30_v0 = vld [vmem:[#allocation4] sm:$0xff]  ;;  %v31_v1 = vld [vmem:[#allocation4 + $0x8] sm:$0xff] }
  0x1f   :  { %s65_s4 = sld [smem:[#allocation3 + $0x1]]  ;;  %s26_s5 = sld [smem:[#allocation3]] }
  0x20   :  { %s133_s1 = smov [#allocation7]  }
  0x21   :  { %s56_s6 = sshll.u32 %s133_s1, 4  ;;  %s57_s6 = int_to_ptr.vmem [resolvable:$true] %s56_s6 }
  0x22   :  { %s103_s7 = scalar_lea.vmem %s57_s6, 256  ;;  %p108_p12 = scmp.lt.s32.totalorder %s57_s6, %s57_s6 }
  0x23   :  { %p104_p11 = scmp.ne.s32.totalorder %s57_s6, %s103_s7  ;;  %p109_p13 = scmp.lt.s32.totalorder %s103_s7, %s103_s7 }
  0x24   :  { %v32_v2 = vstv %s67_s3  ;;  %v35_v3 = vstv %s66_s30 }
  0x25   :  { %v33_v4 = vmul.f32 %v32_v2, %v30_v0  ;;  %v34_v5 = vmul.f32 %v32_v2, %v31_v1  ;;  %v40_v8 = vstv %s65_s4  ;;  %v45_v13 = vstv %s26_s5  ;;  %p110_p0 = por %p109_p13, %p108_p12 }
  0x27   :  { %v36_v6 = vadd.f32 %v35_v3, %v33_v4  ;;  %v37_v7 = vadd.f32 %v35_v3, %v34_v5  ;;  %p111_p1 = pnand %p110_p0, %p104_p11 }
  0x29   :  { %v38_v9 = vmul.f32 %v36_v6, %v30_v0  ;;  %v39_v10 = vmul.f32 %v37_v7, %v31_v1 }
  0x2b   :  { %v41_v11 = vadd.f32 %v40_v8, %v38_v9  ;;  %v42_v12 = vadd.f32 %v40_v8, %v39_v10 }
  0x2d   :  { %v43_v14 = vmul.f32 %v41_v11, %v30_v0  ;;  %v44_v15 = vmul.f32 %v42_v12, %v31_v1 }
  0x2f   :  { %v46_v16 = vadd.f32 %v45_v13, %v43_v14  ;;  %v47_v17 = vadd.f32 %v45_v13, %v44_v15 }
  0x31   :  { %48 = vst [vmem:[#allocation7] sm:$0xff] %v46_v16  ;;  %49 = vst [vmem:[#allocation7 + $0x8] sm:$0xff] %v47_v17 }
  0x32   :  { %114 = shalt.err (!%p111_p1)
}
  0x33   :  { %s115_s10 = scalar_lea.hbm %s187_s2, 256 }
  0x34   :  { %p116_p2 = scmp.ne.s32.totalorder %s187_s2, %s115_s10  ;;  %p119_p3 = scmp.lt.u32.totalorder %s115_s10, %s187_s2 }
  0x36   :  { %p121_p4 = pnand %p119_p3, %p116_p2 }
  0x38   :  { %124 = shalt.err (!%p121_p4)
}
  0x39   :  { %59 = dma.vmem_to_hbm [thread:$0]  %s57_s6, 256, %s187_s2, [#allocation6]  }
  0x3a   :  { %129 = dma.done.wait [#allocation6], 256  }
  0x3b   :  { %130 = vsyncadd [#allocation6], 4294967040 }
  0x3c   :  { %63 = vsyncpa [#allocation5], 1 }
  0x3d   :  { %64 = vsyncpa [#allocation6], 1 }

</bundles_post_ra>
